<compile_context>
chip_gen: v5e
topology: v5e:2x2
jax: 0.10.0
libtpu: 0.0.40
codegen_flags: <defaults>
</compile_context>

<pallas_src>
import jax
import jax.numpy as jnp
from jax.experimental import pallas as pl
from jax.experimental.pallas import tpu as pltpu


def _round_up(x, m):
    return (x + m - 1) // m * m


def _ceil_div(a, b):
    return -(-a // b)


def _rel_pos_emb_kernel(idx_ref, emb_ref, out_ref):
    # idx_ref: (1, TN) int32  -- lane-dense block of flattened lookup indices
    # emb_ref: (Vp, D)        -- row-padded table, resident across grid steps
    # out_ref: (TN, D)        -- gathered embeddings for this row block
    idx = idx_ref[...]                                          # (1, TN)
    vp = emb_ref.shape[0]
    tn = idx.shape[-1]
    # one_hot_t[v, t] = (v == idx[t]); the (1,TN)->(Vp,TN) broadcast of the
    # lane-major indices is a cheap sublane (stride-0) broadcast.  The iota is
    # regenerated each step on purpose: with a "parallel" grid axis a core may
    # never see program_id==0, so a once-only scratch init would be unsafe.
    row = jax.lax.broadcasted_iota(jnp.int32, (vp, tn), 0)      # (Vp, TN)
    one_hot_t = (row == idx).astype(emb_ref.dtype)              # (Vp, TN)
    # MXU gather, contracting over the vocab dim of BOTH operands so no
    # explicit transpose of the one-hot is materialized:
    #   (Vp, TN) x (Vp, D) -[contract dim 0]-> (TN, D), f32 accumulation.
    out_ref[...] = jax.lax.dot_general(
        one_hot_t, emb_ref[...],
        dimension_numbers=(((0,), (0,)), ((), ())),
        preferred_element_type=jnp.float32,
    ).astype(out_ref.dtype)


def _block_vmem_bytes(tn, vp, d, table_itemsize, out_itemsize):
    """Per-block VMEM footprint estimate (excludes the resident table)."""
    onehot = vp * tn * (4 + table_itemsize)    # iota/compare mask + one-hot MXU operand
    acc = tn * d * 4                           # f32 matmul result
    out = 2 * tn * d * max(out_itemsize, 4)    # double-buffered output block
    idxb = 2 * tn * 4                          # double-buffered lane-dense index block
    return onehot + acc + out + idxb


def _vmem_physical_bytes():
    try:
        info = pltpu.get_tpu_info()
        return int(getattr(info, "vmem_capacity_bytes", 64 * 1024 * 1024))
    except Exception:                      # interpret mode / very old jax
        return 64 * 1024 * 1024            # v7x per-TC (smallest current part)


def relative_position_embedding(indices, embeddings, *, block_rows=1024,
                                min_kernel_rows=1024, force_kernel=False,
                                compute_dtype=None):
    """Pallas equivalent of RelativePositionEmbedding.forward.

    indices:    integer array of arbitrary shape, values in [0, 2*max_position].
    embeddings: (2*max_position + 1, head_dim) table.
    Returns an array of shape indices.shape + (head_dim,) in embeddings.dtype.

    Notes:
      * out-of-range / negative indices produce all-zero rows (PyTorch
        F.embedding would raise);
      * compute_dtype=jnp.bfloat16 selects the fast bf16 MXU path (values are
        bf16-rounded table entries); None keeps exact f32 lookups.
    """
    orig_shape = indices.shape
    v, d = embeddings.shape
    idx = jnp.asarray(indices).reshape(-1).astype(jnp.int32)
    n = int(idx.shape[0])

    # A one-step grid with a few KiB of output can't beat XLA's native gather.
    if n < min_kernel_rows and not force_kernel:
        return jnp.take(embeddings, idx, axis=0).reshape(*orig_shape, d)

    table_dtype = compute_dtype if compute_dtype is not None else embeddings.dtype
    table_itemsize = jnp.dtype(table_dtype).itemsize
    out_itemsize = jnp.dtype(embeddings.dtype).itemsize

    # Vocab (MXU K) padding: 128-aligned; 256-aligned for packed (bf16) tables
    # with big vocabularies so K tiles fill the 2x256 MXUs of v6e/v7x.
    v_align = 256 if (table_itemsize < 4 and v > 256) else 128
    vp = _round_up(v, v_align)

    # Generation-aware VMEM budget (~55% of one TensorCore's VMEM; the table is
    # duplicated per core when the "parallel" axis is split across v7x's 2 TCs).
    vmem_physical = _vmem_physical_bytes()
    vmem_budget = int(vmem_physical * 0.55)

    table_bytes = vp * d * table_itemsize
    if table_bytes > vmem_budget:
        # TODO(synk): vocab-tiled / true row-gather kernel (scalar-prefetch
        # indices + dynamic-slice loads) for very large tables, esp. on v5e.
        return jnp.take(embeddings, idx, axis=0).reshape(*orig_shape, d)

    # Row-block size: big blocks amortize the ~0.35us per-grid-step overhead;
    # balance across blocks and keep a multiple of 128 so the (1, tn) index
    # block and the lane-major one-hot stay lane-dense.  Shrink only if the
    # per-block VMEM would not fit next to the resident table.
    block_rows = max(128, _round_up(block_rows, 128))
    num_blocks = max(1, _ceil_div(n, block_rows))
    tn = _round_up(_ceil_div(n, num_blocks), 128)
    while tn > 128 and table_bytes + _block_vmem_bytes(
            tn, vp, d, table_itemsize, out_itemsize) > vmem_budget:
        tn = max(128, _round_up(tn // 2, 128))
    num_blocks = _ceil_div(n, tn)
    n_pad = num_blocks * tn

    # Padded/cast table and lane-dense index row; skipped when already aligned
    # (for static embeddings the tiny row-pad is hoistable by the caller).
    table = embeddings if table_dtype == embeddings.dtype else embeddings.astype(table_dtype)
    if vp != v:
        table = jnp.pad(table, ((0, vp - v), (0, 0)))
    idx_row = (idx if n_pad == n else jnp.pad(idx, (0, n_pad - n))).reshape(1, n_pad)

    est = table_bytes + _block_vmem_bytes(tn, vp, d, table_itemsize, out_itemsize)
    # Prefer raising the scoped-VMEM limit over shrinking TN (the default
    # 16/32 MiB scoped limit, not physical VMEM, is the binding constraint on
    # 128 MiB v5e/v6e parts).
    vmem_limit = int(min(vmem_physical * 9 // 10, max(2 * est, 48 * 1024 * 1024)))
    compiler_params = pltpu.CompilerParams(
        dimension_semantics=("parallel",),   # v7x: row blocks split across 2 TCs
        vmem_limit_bytes=vmem_limit,
    )

    out_shape = jax.ShapeDtypeStruct((n_pad, d), embeddings.dtype)

    def _call(table_pipeline_mode):
        if table_pipeline_mode is None:
            table_spec = pl.BlockSpec((vp, d), lambda i: (0, 0))
        else:
            # Constant index_map => fetched exactly once; single-buffer it so
            # the dominant VMEM term is not duplicated.
            table_spec = pl.BlockSpec((vp, d), lambda i: (0, 0),
                                      pipeline_mode=table_pipeline_mode)
        return pl.pallas_call(
            _rel_pos_emb_kernel,
            out_shape=out_shape,
            grid_spec=pltpu.PrefetchScalarGridSpec(
                num_scalar_prefetch=0,
                grid=(num_blocks,),
                in_specs=[
                    # Lane-dense index block: contiguous tn*4-byte DMA.
                    pl.BlockSpec((1, tn), lambda i: (0, i)),
                    table_spec,
                ],
                # Output last dim is the true head_dim (== full array dim, so
                # legal even when d < 128): no padded-Dp write amplification
                # and no wrapper [:, :d] slice copy.
                out_specs=pl.BlockSpec((tn, d), lambda i: (i, 0)),
            ),
            compiler_params=compiler_params,
        )(idx_row, table)

    try:
        out = _call(pl.Buffered(1))
    except Exception:
        # Fallback for jax versions without single-buffered pipeline_mode.
        out = _call(None)

    if n_pad != n:
        out = out[:n]
    # TODO(synk): for peak throughput, fuse this gather into the downstream
    # rel-pos attention matmul so the gathered rows never round-trip HBM.
    return out.reshape(*orig_shape, d)


def init_embeddings(key, head_dim, max_position, norm_init=True):
    """Deterministic stand-in for nn.init.xavier_normal_/uniform_ on the
    (2*max_position+1, head_dim) parameter."""
    vocab = 2 * max_position + 1
    fan_out, fan_in = vocab, head_dim           # PyTorch 2-D convention
    if norm_init:
        std = (2.0 / (fan_in + fan_out)) ** 0.5
        return std * jax.random.normal(key, (vocab, head_dim), jnp.float32)
    else:
        a = (6.0 / (fan_in + fan_out)) ** 0.5
        return jax.random.uniform(key, (vocab, head_dim), jnp.float32, -a, a)


if __name__ == "__main__":
    head_dim = 32
    max_position = 16
    vocab = 2 * max_position + 1   # 33

    key = jax.random.PRNGKey(0)
    k_emb, k_idx1, k_idx2 = jax.random.split(key, 3)

    embeddings = init_embeddings(k_emb, head_dim, max_position, norm_init=True)

    # Case 1: (seq, seq) relative-position index matrix -> one 256-row block,
    # no row padding (exercises the slice-free path).
    seq = 16
    idx1 = jax.random.randint(k_idx1, (seq, seq), 0, vocab, dtype=jnp.int32)
    out1 = jax.block_until_ready(
        relative_position_embedding(idx1, embeddings, force_kernel=True))
    ref1 = jnp.take(embeddings, idx1, axis=0)
    assert out1.shape == (seq, seq, head_dim)
    assert jnp.allclose(out1, ref1, atol=1e-6), "case 1: mismatch vs reference gather"

    # Case 2: batched, non-block-divisible N (2*24*24 = 1152 -> 2 blocks of 640,
    # padded to 1280; exercises multi-block + row-pad slicing).
    idx2 = jax.random.randint(k_idx2, (2, 24, 24), 0, vocab, dtype=jnp.int32)
    out2 = jax.block_until_ready(
        relative_position_embedding(idx2, embeddings, force_kernel=True))
    ref2 = jnp.take(embeddings, idx2, axis=0)
    assert out2.shape == (2, 24, 24, head_dim)
    assert jnp.allclose(out2, ref2, atol=1e-6), "case 2: mismatch vs reference gather"

    print("KERNEL_OK")
</pallas_src>

<mosaic_0001>
module attributes {stable_mosaic.version = 11 : i64} {
  func.func @_rel_pos_emb_kernel(%arg0: i32, %arg1: memref<1x256xi32, #tpu.memory_space<vmem>>, %arg2: memref<128x32xf32, #tpu.memory_space<vmem>>, %arg3: memref<256x32xf32, #tpu.memory_space<vmem>>) attributes {dimension_semantics = [#tpu.dimension_semantics<parallel>], iteration_bounds = array<i64: 1>, scalar_prefetch = 0 : i64, scratch_operands = 0 : i64, tpu.core_type = #tpu.core_type<tc>, window_params = [{transform_indices = @transform_0, window_bounds = array<i64: 1, 256>}, {pipeline_mode = #tpu.pipeline_mode<synchronous>, transform_indices = @transform_1, window_bounds = array<i64: 128, 32>}, {transform_indices = @transform_2, window_bounds = array<i64: 256, 32>}]} {
    %c0 = arith.constant 0 : index
    %c0_0 = arith.constant 0 : index
    %0 = vector.load %arg1[%c0, %c0_0] : memref<1x256xi32, #tpu.memory_space<vmem>>, vector<1x256xi32>
    %1 = tpu.iota {dimensions = array<i32: 0>} : vector<128x256xi32>
    %2 = vector.broadcast %0 : vector<1x256xi32> to vector<128x256xi32>
    %3 = arith.cmpi eq, %1, %2 : vector<128x256xi32>
    %4 = arith.extui %3 : vector<128x256xi1> to vector<128x256xi32>
    %5 = arith.sitofp %4 : vector<128x256xi32> to vector<128x256xf32>
    %c0_1 = arith.constant 0 : index
    %c0_2 = arith.constant 0 : index
    %6 = vector.load %arg2[%c0_1, %c0_2] : memref<128x32xf32, #tpu.memory_space<vmem>>, vector<128x32xf32>
    %cst = arith.constant dense<0.000000e+00> : vector<256x32xf32>
    %7 = tpu.matmul %5, %6, %cst {dimension_numbers = #tpu.dot_dimension_numbers<[0], [0], [1], [1], [0, 1, 1, 1], [], []>} : vector<128x256xf32>, vector<128x32xf32>, vector<256x32xf32> -> vector<256x32xf32>
    %c0_3 = arith.constant 0 : index
    %c0_4 = arith.constant 0 : index
    %8 = vector.load %arg3[%c0_3, %c0_4] : memref<256x32xf32, #tpu.memory_space<vmem>>, vector<256x32xf32>
    tpu.vector_store %arg3[%c0_3, %c0_4], %7 {strides = array<i32>} : memref<256x32xf32, #tpu.memory_space<vmem>>, vector<256x32xf32>,
    return
  }
  func.func @transform_0(%arg0: i32) -> (i32, i32) {
    %c0_i32 = arith.constant 0 : i32
    %c0_i32_0 = arith.constant 0 : i32
    return %c0_i32, %arg0 : i32, i32
  }
  func.func @transform_1(%arg0: i32) -> (i32, i32) {
    %c0_i32 = arith.constant 0 : i32
    %c0_i32_0 = arith.constant 0 : i32
    %c0_i32_1 = arith.constant 0 : i32
    return %c0_i32, %c0_i32_0 : i32, i32
  }
  func.func @transform_2(%arg0: i32) -> (i32, i32) {
    %c0_i32 = arith.constant 0 : i32
    %c0_i32_0 = arith.constant 0 : i32
    return %arg0, %c0_i32 : i32, i32
  }
}

module attributes {stable_mosaic.version = 11 : i64} {
  func.func @_rel_pos_emb_kernel(%arg0: i32, %arg1: memref<1x256xi32, #tpu.memory_space<vmem>>, %arg2: memref<128x32xf32, #tpu.memory_space<vmem>>, %arg3: memref<256x32xf32, #tpu.memory_space<vmem>>) attributes {dimension_semantics = [#tpu.dimension_semantics<parallel>], iteration_bounds = array<i64: 1>, scalar_prefetch = 0 : i64, scratch_operands = 0 : i64, tpu.core_type = #tpu.core_type<tc>, window_params = [{transform_indices = @transform_0, window_bounds = array<i64: 1, 256>}, {pipeline_mode = #tpu.pipeline_mode<synchronous>, transform_indices = @transform_1, window_bounds = array<i64: 128, 32>}, {transform_indices = @transform_2, window_bounds = array<i64: 256, 32>}]} {
    %c0 = arith.constant 0 : index
    %c0_0 = arith.constant 0 : index
    %0 = vector.load %arg1[%c0, %c0_0] : memref<1x256xi32, #tpu.memory_space<vmem>>, vector<1x256xi32>
    %1 = tpu.iota {dimensions = array<i32: 0>} : vector<128x256xi32>
    %2 = vector.broadcast %0 : vector<1x256xi32> to vector<128x256xi32>
    %3 = arith.cmpi eq, %1, %2 : vector<128x256xi32>
    %4 = arith.extui %3 : vector<128x256xi1> to vector<128x256xi32>
    %5 = arith.sitofp %4 : vector<128x256xi32> to vector<128x256xf32>
    %c0_1 = arith.constant 0 : index
    %c0_2 = arith.constant 0 : index
    %6 = vector.load %arg2[%c0_1, %c0_2] : memref<128x32xf32, #tpu.memory_space<vmem>>, vector<128x32xf32>
    %cst = arith.constant dense<0.000000e+00> : vector<256x32xf32>
    %7 = tpu.matmul %5, %6, %cst {dimension_numbers = #tpu.dot_dimension_numbers<[0], [0], [1], [1], [0, 1, 1, 1], [], []>} : vector<128x256xf32>, vector<128x32xf32>, vector<256x32xf32> -> vector<256x32xf32>
    %c0_3 = arith.constant 0 : index
    %c0_4 = arith.constant 0 : index
    %8 = vector.load %arg3[%c0_3, %c0_4] : memref<256x32xf32, #tpu.memory_space<vmem>>, vector<256x32xf32>
    tpu.vector_store %arg3[%c0_3, %c0_4], %7 {strides = array<i32>} : memref<256x32xf32, #tpu.memory_space<vmem>>, vector<256x32xf32>,
    return
  }
  func.func @transform_0(%arg0: i32) -> (i32, i32) {
    %c0_i32 = arith.constant 0 : i32
    %c0_i32_0 = arith.constant 0 : i32
    return %c0_i32, %arg0 : i32, i32
  }
  func.func @transform_1(%arg0: i32) -> (i32, i32) {
    %c0_i32 = arith.constant 0 : i32
    %c0_i32_0 = arith.constant 0 : i32
    %c0_i32_1 = arith.constant 0 : i32
    return %c0_i32, %c0_i32_0 : i32, i32
  }
  func.func @transform_2(%arg0: i32) -> (i32, i32) {
    %c0_i32 = arith.constant 0 : i32
    %c0_i32_0 = arith.constant 0 : i32
    return %arg0, %c0_i32 : i32, i32
  }
}

</mosaic_0001>

<bundles_post_ra>
// kernel: tpu_custom_call.1
= control target key start
LH: loop header
LB: loop body
LE: loop exit
PB: predicated region body
PF: predicated region fallthrough
CT: control target
= control target key end

     0   :  { %v12_v0 = vlaneseq  ;;  %v550_v6 = vmov 0.0   ;;  %s832_s0 = inlined_call_operand.vmem [shape: s32[1,256], index: 0, kind: input, shape index: {}]   ;;  %s833_s1 = inlined_call_operand.vmem [shape: f32[128,32], index: 1, kind: input, shape index: {}]   ;;  %s834_s2 = inlined_call_operand.vmem [shape: f32[256,32], index: 2, kind: output, shape index: {}]  }
   0x1   :  { %v11_v1 = vld [vmem:[%s832_s0] sm:$0x3]  ;;  %v142_v54 = vld [vmem:[%s833_s1 + $0x78] sm:$0xff]  ;;  %v141_v55 = vld [vmem:[%s833_s1 + $0x70] sm:$0xff] }
   0x2   :  { %v569_v2 = vshrl.u32 %v12_v0, 7  ;;  %v571_v3 = vperm.slane %v11_v1, 0  ;;  %v573_v4 = vperm.slane %v11_v1, 1  ;;  %207 = vmatpush.msra.mxu0 %v142_v54  ;;  %390 = vmatpush.msra.mxu2 %v142_v54  ;;  %v140_v59 = vld [vmem:[%s833_s1 + $0x68] sm:$0xff]  ;;  %v139_v61 = vld [vmem:[%s833_s1 + $0x60] sm:$0xff]  ;;  %v138_v62 = vld [vmem:[%s833_s1 + $0x58] sm:$0xff] }
   0x3   :  { %389 = vmatpush.msra.mxu1 %v142_v54  ;;  %391 = vmatpush.msra.mxu3 %v142_v54  ;;  %v137_v63 = vld [vmem:[%s833_s1 + $0x50] sm:$0xff] }
   0x4   :  { %vm31_vm0 = vcmp.eq.s32.totalorder %v569_v2, %v571_v3  ;;  %vm32_vm1 = vcmp.eq.s32.totalorder %v569_v2, %v573_v4  ;;  %v14_v5 = vadd.s32 8, %v569_v2  ;;  %v15_v12 = vadd.s32 16, %v569_v2  ;;  %208 = vmatpush.msra.mxu0 %v141_v55  ;;  %393 = vmatpush.msra.mxu2 %v141_v55 }
   0x5   :  { %v357_v7 = vsel %vm31_vm0, 1.0, %v550_v6  ;;  %v358_v8 = vsel %vm32_vm1, 1.0, %v550_v6  ;;  %v16_v16 = vadd.s32 24, %v569_v2  ;;  %v17_v20 = vadd.s32 32, %v569_v2  ;;  %392 = vmatpush.msra.mxu1 %v141_v55  ;;  %394 = vmatpush.msra.mxu3 %v141_v55 }
   0x6   :  { %v438_v9 = vpack.i.bf16 %v357_v7, %v358_v8  ;;  %vm33_vm2 = vcmp.eq.s32.totalorder %v14_v5, %v571_v3  ;;  %vm34_vm3 = vcmp.eq.s32.totalorder %v14_v5, %v573_v4  ;;  %vm35_vm4 = vcmp.eq.s32.totalorder %v15_v12, %v571_v3  ;;  %209 = vmatpush.msra.mxu0 %v140_v59  ;;  %v136_v7 = vld [vmem:[%s833_s1 + $0x48] sm:$0xff] }
   0x7   :  { %v359_v10 = vsel %vm33_vm2, 1.0, %v550_v6  ;;  %v360_v11 = vsel %vm34_vm3, 1.0, %v550_v6  ;;  %vm36_vm5 = vcmp.eq.s32.totalorder %v15_v12, %v573_v4  ;;  %v361_v14 = vsel %vm35_vm4, 1.0, %v550_v6  ;;  %396 = vmatpush.msra.mxu2 %v140_v59  ;;  %395 = vmatpush.msra.mxu1 %v140_v59 }
   0x8   :  { %439 = vxpose.xlu0.b32.start [1/16] %v438_v9, 128  ;;  %v440_v13 = vpack.i.bf16 %v359_v10, %v360_v11  ;;  %v362_v15 = vsel %vm36_vm5, 1.0, %v550_v6  ;;  %vm37_vm6 = vcmp.eq.s32.totalorder %v16_v16, %v571_v3  ;;  %vm38_vm7 = vcmp.eq.s32.totalorder %v16_v16, %v573_v4  ;;  %397 = vmatpush.msra.mxu3 %v140_v59  ;;  %v135_v9 = vld [vmem:[%s833_s1 + $0x40] sm:$0xff]  ;;  %v134_v10 = vld [vmem:[%s833_s1 + $0x38] sm:$0xff]  ;;  %v133_v11 = vld [vmem:[%s833_s1 + $0x30] sm:$0xff] }
   0x9   :  { %v442_v17 = vpack.i.bf16 %v361_v14, %v362_v15  ;;  %v363_v18 = vsel %vm37_vm6, 1.0, %v550_v6  ;;  %v364_v19 = vsel %vm38_vm7, 1.0, %v550_v6  ;;  %vm39_vm8 = vcmp.eq.s32.totalorder %v17_v20, %v571_v3  ;;  %210 = vmatpush.msra.mxu0 %v139_v61  ;;  %399 = vmatpush.msra.mxu2 %v139_v61  ;;  %v132_v15 = vld [vmem:[%s833_s1 + $0x28] sm:$0xff] }
   0xa   :  { %v444_v21 = vpack.i.bf16 %v363_v18, %v364_v19  ;;  %vm40_vm9 = vcmp.eq.s32.totalorder %v17_v20, %v573_v4  ;;  %v365_v22 = vsel %vm39_vm8, 1.0, %v550_v6  ;;  %v18_v24 = vadd.s32 40, %v569_v2  ;;  %398 = vmatpush.msra.mxu1 %v139_v61  ;;  %400 = vmatpush.msra.mxu3 %v139_v61  ;;  %v129_v18 = vld [vmem:[%s833_s1 + $0x10] sm:$0xff] }
   0xb   :  { %v366_v23 = vsel %vm40_vm9, 1.0, %v550_v6  ;;  %v19_v28 = vadd.s32 48, %v569_v2  ;;  %v20_v32 = vadd.s32 56, %v569_v2  ;;  %v21_v36 = vadd.s32 64, %v569_v2  ;;  %211 = vmatpush.msra.mxu0 %v138_v62  ;;  %402 = vmatpush.msra.mxu2 %v138_v62 }
   0xc   :  { %v446_v25 = vpack.i.bf16 %v365_v22, %v366_v23  ;;  %vm41_vm10 = vcmp.eq.s32.totalorder %v18_v24, %v571_v3  ;;  %vm42_vm11 = vcmp.eq.s32.totalorder %v18_v24, %v573_v4  ;;  %v22_v40 = vadd.s32 72, %v569_v2  ;;  %401 = vmatpush.msra.mxu1 %v138_v62  ;;  %403 = vmatpush.msra.mxu3 %v138_v62 }
   0xd   :  { %v367_v26 = vsel %vm41_vm10, 1.0, %v550_v6  ;;  %v368_v27 = vsel %vm42_vm11, 1.0, %v550_v6  ;;  %vm43_vm12 = vcmp.eq.s32.totalorder %v19_v28, %v571_v3  ;;  %vm44_vm13 = vcmp.eq.s32.totalorder %v19_v28, %v573_v4  ;;  %212 = vmatpush.msra.mxu0 %v137_v63  ;;  %405 = vmatpush.msra.mxu2 %v137_v63 }
   0xe   :  { %v448_v29 = vpack.i.bf16 %v367_v26, %v368_v27  ;;  %v369_v30 = vsel %vm43_vm12, 1.0, %v550_v6  ;;  %v370_v31 = vsel %vm44_vm13, 1.0, %v550_v6  ;;  %vm45_vm14 = vcmp.eq.s32.totalorder %v20_v32, %v571_v3  ;;  %404 = vmatpush.msra.mxu1 %v137_v63  ;;  %406 = vmatpush.msra.mxu3 %v137_v63 }
   0xf   :  { %v450_v33 = vpack.i.bf16 %v369_v30, %v370_v31  ;;  %vm46_vm15 = vcmp.eq.s32.totalorder %v20_v32, %v573_v4  ;;  %v371_v34 = vsel %vm45_vm14, 1.0, %v550_v6  ;;  %vm47_vm0 = vcmp.eq.s32.totalorder %v21_v36, %v571_v3  ;;  %213 = vmatpush.msra.mxu0 %v136_v7  ;;  %408 = vmatpush.msra.mxu2 %v136_v7 }
  0x10   :  { %441 = vxpose.xlu0.b32.cont [2/16] %v440_v13, 128  ;;  %v372_v35 = vsel %vm46_vm15, 1.0, %v550_v6  ;;  %vm48_vm1 = vcmp.eq.s32.totalorder %v21_v36, %v573_v4  ;;  %v373_v38 = vsel %vm47_vm0, 1.0, %v550_v6  ;;  %vm49_vm2 = vcmp.eq.s32.totalorder %v22_v40, %v571_v3  ;;  %407 = vmatpush.msra.mxu1 %v136_v7 }
  0x11   :  { %v452_v37 = vpack.i.bf16 %v371_v34, %v372_v35  ;;  %v374_v39 = vsel %vm48_vm1, 1.0, %v550_v6  ;;  %vm50_vm3 = vcmp.eq.s32.totalorder %v22_v40, %v573_v4  ;;  %v375_v42 = vsel %vm49_vm2, 1.0, %v550_v6  ;;  %214 = vmatpush.msra.mxu0 %v135_v9  ;;  %411 = vmatpush.msra.mxu2 %v135_v9 }
  0x12   :  { %v454_v41 = vpack.i.bf16 %v373_v38, %v374_v39  ;;  %v376_v43 = vsel %vm50_vm3, 1.0, %v550_v6  ;;  %v23_v44 = vadd.s32 80, %v569_v2  ;;  %v24_v48 = vadd.s32 88, %v569_v2  ;;  %409 = vmatpush.msra.mxu3 %v136_v7  ;;  %410 = vmatpush.msra.mxu1 %v135_v9 }
  0x13   :  { %v456_v45 = vpack.i.bf16 %v375_v42, %v376_v43  ;;  %v25_v52 = vadd.s32 96, %v569_v2  ;;  %v26_v58 = vadd.s32 104, %v569_v2  ;;  %v27_v5 = vadd.s32 112, %v569_v2  ;;  %215 = vmatpush.msra.mxu0 %v134_v10  ;;  %414 = vmatpush.msra.mxu2 %v134_v10 }
  0x14   :  { %vm51_vm4 = vcmp.eq.s32.totalorder %v23_v44, %v571_v3  ;;  %vm52_vm5 = vcmp.eq.s32.totalorder %v23_v44, %v573_v4  ;;  %vm53_vm6 = vcmp.eq.s32.totalorder %v24_v48, %v571_v3  ;;  %vm54_vm7 = vcmp.eq.s32.totalorder %v24_v48, %v573_v4  ;;  %412 = vmatpush.msra.mxu3 %v135_v9 }
  0x15   :  { %v377_v46 = vsel %vm51_vm4, 1.0, %v550_v6  ;;  %v378_v47 = vsel %vm52_vm5, 1.0, %v550_v6  ;;  %v379_v50 = vsel %vm53_vm6, 1.0, %v550_v6  ;;  %v380_v51 = vsel %vm54_vm7, 1.0, %v550_v6  ;;  %216 = vmatpush.msra.mxu0 %v133_v11  ;;  %417 = vmatpush.msra.mxu2 %v133_v11 }
  0x16   :  { %v458_v49 = vpack.i.bf16 %v377_v46, %v378_v47  ;;  %v460_v53 = vpack.i.bf16 %v379_v50, %v380_v51  ;;  %vm55_vm8 = vcmp.eq.s32.totalorder %v25_v52, %v571_v3  ;;  %vm56_vm9 = vcmp.eq.s32.totalorder %v25_v52, %v573_v4  ;;  %413 = vmatpush.msra.mxu1 %v134_v10 }
  0x17   :  { %v381_v56 = vsel %vm55_vm8, 1.0, %v550_v6  ;;  %v382_v57 = vsel %vm56_vm9, 1.0, %v550_v6  ;;  %vm57_vm10 = vcmp.eq.s32.totalorder %v26_v58, %v571_v3  ;;  %vm58_vm11 = vcmp.eq.s32.totalorder %v26_v58, %v573_v4  ;;  %415 = vmatpush.msra.mxu3 %v134_v10  ;;  %217 = vmatpush.msra.mxu0 %v132_v15 }
  0x18   :  { %443 = vxpose.xlu0.b32.cont [3/16] %v442_v17, 128  ;;  %v462_v60 = vpack.i.bf16 %v381_v56, %v382_v57  ;;  %v383_v0 = vsel %vm57_vm10, 1.0, %v550_v6  ;;  %v384_v1 = vsel %vm58_vm11, 1.0, %v550_v6  ;;  %vm59_vm12 = vcmp.eq.s32.totalorder %v27_v5, %v571_v3  ;;  %v131_v17 = vld [vmem:[%s833_s1 + $0x20] sm:$0xff]  ;;  %420 = vmatpush.msra.mxu2 %v132_v15 }
  0x19   :  { %v464_v8 = vpack.i.bf16 %v383_v0, %v384_v1  ;;  %vm60_vm13 = vcmp.eq.s32.totalorder %v27_v5, %v573_v4  ;;  %v385_v12 = vsel %vm59_vm12, 1.0, %v550_v6  ;;  %v28_v14 = vadd.s32 120, %v569_v2  ;;  %v130_v2 = vld [vmem:[%s833_s1 + $0x18] sm:$0xff]  ;;  %416 = vmatpush.msra.mxu1 %v133_v11  ;;  %418 = vmatpush.msra.mxu3 %v133_v11 }
  0x1a   :  { %v386_v13 = vsel %vm60_vm13, 1.0, %v550_v6  ;;  %218 = vmatpush.msra.mxu0 %v131_v17  ;;  %423 = vmatpush.msra.mxu2 %v131_v17  ;;  %vm320_vm0 = vcmask 261120  }
  0x1b   :  { %v466_v16 = vpack.i.bf16 %v385_v12, %v386_v13  ;;  %vm61_vm14 = vcmp.eq.s32.totalorder %v28_v14, %v571_v3  ;;  %vm62_vm15 = vcmp.eq.s32.totalorder %v28_v14, %v573_v4  ;;  %419 = vmatpush.msra.mxu1 %v132_v15  ;;  %v128_v4 = vld [vmem:[%s833_s1 + $0x8] sm:$0xff]  ;;  %421 = vmatpush.msra.mxu3 %v132_v15 }
  0x1c   :  { %v387_v19 = vsel %vm61_vm14, 1.0, %v550_v6  ;;  %v388_v3 = vsel %vm62_vm15, 1.0, %v550_v6  ;;  %219 = vmatpush.msra.mxu0 %v130_v2  ;;  %426 = vmatpush.msra.mxu2 %v130_v2  ;;  %v127_v6 = vld [vmem:[%s833_s1] sm:$0xff] }
  0x1d   :  { %422 = vmatpush.msra.mxu1 %v131_v17  ;;  %v468_v20 = vpack.i.bf16 %v387_v19, %v388_v3  ;;  %424 = vmatpush.msra.mxu3 %v131_v17 }
  0x1e   :  { %220 = vmatpush.msra.mxu0 %v129_v18  ;;  %429 = vmatpush.msra.mxu2 %v129_v18 }
  0x1f   :  { %425 = vmatpush.msra.mxu1 %v130_v2  ;;  %427 = vmatpush.msra.mxu3 %v130_v2 }
  0x20   :  { %445 = vxpose.xlu0.b32.cont [4/16] %v444_v21, 128  ;;  %221 = vmatpush.msra.mxu0 %v128_v4 }
  0x21   :  { %432 = vmatpush.msra.mxu2 %v128_v4  ;;  %428 = vmatpush.msra.mxu1 %v129_v18 }
  0x22   :  { %430 = vmatpush.msra.mxu3 %v129_v18  ;;  %222 = vmatpush.msra.mxu0 %v127_v6 }
  0x23   :  { %431 = vmatpush.msra.mxu1 %v128_v4  ;;  %435 = vmatpush.msra.mxu2 %v127_v6 }
  0x24   :  { %433 = vmatpush.msra.mxu3 %v128_v4 }
  0x25   :  { %434 = vmatpush.msra.mxu1 %v127_v6 }
  0x26   :  { %436 = vmatpush.msra.mxu3 %v127_v6 }
  0x28   :  { %447 = vxpose.xlu0.b32.cont [5/16] %v446_v25, 128 }
  0x30   :  { %449 = vxpose.xlu0.b32.cont [6/16] %v448_v29, 128 }
  0x38   :  { %451 = vxpose.xlu0.b32.cont [7/16] %v450_v33, 128 }
  0x40   :  { %453 = vxpose.xlu0.b32.cont [8/16] %v452_v37, 128 }
  0x48   :  { %455 = vxpose.xlu0.b32.cont [9/16] %v454_v41, 128 }
  0x50   :  { %457 = vxpose.xlu0.b32.cont [10/16] %v456_v45, 128 }
  0x58   :  { %459 = vxpose.xlu0.b32.cont [11/16] %v458_v49, 128 }
  0x60   :  { %461 = vxpose.xlu0.b32.cont [12/16] %v460_v53, 128 }
  0x68   :  { %463 = vxpose.xlu0.b32.cont [13/16] %v462_v60, 128 }
  0x70   :  { %465 = vxpose.xlu0.b32.cont [14/16] %v464_v8, 128 }
  0x78   :  { %467 = vxpose.xlu0.b32.cont [15/16] %v466_v16, 128 }
  0x80   :  { %469 = vxpose.xlu0.b32.end [16/16] %v468_v20, 128 }
  0xac   :  { %v470_v21 = vpop.trf.xlu0 }
  0xad   :  { %v474_v22 = vunpack.i.h.bf16 %v470_v21  ;;  %v471_v23 = vunpack.i.l.bf16 %v470_v21 }
  0xaf   :  { %223 = vmatmul.f32.vlgmr.msra.gmra.mxu0 %v474_v22  ;;  %271 = vmatmul.f32.vlgmr.msra.gmra.mxu2 %v471_v23 }
  0xb4   :  { %v475_v24 = vpop.trf.xlu0 }
  0xb5   :  { %v479_v25 = vunpack.i.h.bf16 %v475_v24  ;;  %v476_v26 = vunpack.i.l.bf16 %v475_v24 }
  0xb7   :  { %226 = vmatmul.f32.gmra.mxu0 %v479_v25  ;;  %274 = vmatmul.f32.gmra.mxu2 %v476_v26 }
  0xbc   :  { %v480_v27 = vpop.trf.xlu0 }
  0xbd   :  { %v484_v28 = vunpack.i.h.bf16 %v480_v27  ;;  %v481_v29 = vunpack.i.l.bf16 %v480_v27 }
  0xbf   :  { %229 = vmatmul.f32.gmra.mxu0 %v484_v28  ;;  %277 = vmatmul.f32.gmra.mxu2 %v481_v29 }
  0xc4   :  { %v485_v30 = vpop.trf.xlu0 }
  0xc5   :  { %v489_v31 = vunpack.i.h.bf16 %v485_v30  ;;  %v486_v32 = vunpack.i.l.bf16 %v485_v30 }
  0xc7   :  { %232 = vmatmul.f32.gmra.mxu0 %v489_v31  ;;  %280 = vmatmul.f32.gmra.mxu2 %v486_v32 }
  0xcc   :  { %v490_v33 = vpop.trf.xlu0 }
  0xcd   :  { %v494_v34 = vunpack.i.h.bf16 %v490_v33  ;;  %v491_v35 = vunpack.i.l.bf16 %v490_v33 }
  0xcf   :  { %235 = vmatmul.f32.gmra.mxu0 %v494_v34  ;;  %283 = vmatmul.f32.gmra.mxu2 %v491_v35 }
  0xd4   :  { %v495_v36 = vpop.trf.xlu0 }
  0xd5   :  { %v499_v37 = vunpack.i.h.bf16 %v495_v36  ;;  %v496_v38 = vunpack.i.l.bf16 %v495_v36 }
  0xd7   :  { %238 = vmatmul.f32.gmra.mxu0 %v499_v37  ;;  %286 = vmatmul.f32.gmra.mxu2 %v496_v38 }
  0xdc   :  { %v500_v39 = vpop.trf.xlu0 }
  0xdd   :  { %v504_v40 = vunpack.i.h.bf16 %v500_v39  ;;  %v501_v41 = vunpack.i.l.bf16 %v500_v39 }
  0xdf   :  { %241 = vmatmul.f32.gmra.mxu0 %v504_v40  ;;  %289 = vmatmul.f32.gmra.mxu2 %v501_v41 }
  0xe4   :  { %v505_v42 = vpop.trf.xlu0 }
  0xe5   :  { %v509_v43 = vunpack.i.h.bf16 %v505_v42  ;;  %v506_v44 = vunpack.i.l.bf16 %v505_v42 }
  0xe7   :  { %244 = vmatmul.f32.gmra.mxu0 %v509_v43  ;;  %292 = vmatmul.f32.gmra.mxu2 %v506_v44 }
  0xec   :  { %v510_v45 = vpop.trf.xlu0 }
  0xed   :  { %v514_v46 = vunpack.i.h.bf16 %v510_v45  ;;  %v511_v47 = vunpack.i.l.bf16 %v510_v45 }
  0xef   :  { %247 = vmatmul.f32.vlgmr.msra.gmra.mxu1 %v514_v46  ;;  %295 = vmatmul.f32.vlgmr.msra.gmra.mxu3 %v511_v47 }
  0xf4   :  { %v515_v48 = vpop.trf.xlu0 }
  0xf5   :  { %v519_v49 = vunpack.i.h.bf16 %v515_v48  ;;  %v516_v50 = vunpack.i.l.bf16 %v515_v48 }
  0xf7   :  { %250 = vmatmul.f32.gmra.mxu1 %v519_v49  ;;  %298 = vmatmul.f32.gmra.mxu3 %v516_v50 }
  0xfc   :  { %v520_v51 = vpop.trf.xlu0 }
  0xfd   :  { %v524_v52 = vunpack.i.h.bf16 %v520_v51  ;;  %v521_v53 = vunpack.i.l.bf16 %v520_v51 }
  0xff   :  { %253 = vmatmul.f32.gmra.mxu1 %v524_v52  ;;  %301 = vmatmul.f32.gmra.mxu3 %v521_v53 }
 0x104   :  { %v525_v54 = vpop.trf.xlu0 }
 0x105   :  { %v529_v55 = vunpack.i.h.bf16 %v525_v54  ;;  %v526_v56 = vunpack.i.l.bf16 %v525_v54 }
 0x107   :  { %256 = vmatmul.f32.gmra.mxu1 %v529_v55  ;;  %304 = vmatmul.f32.gmra.mxu3 %v526_v56 }
 0x10c   :  { %v530_v57 = vpop.trf.xlu0 }
 0x10d   :  { %v534_v58 = vunpack.i.h.bf16 %v530_v57  ;;  %v531_v59 = vunpack.i.l.bf16 %v530_v57 }
 0x10f   :  { %259 = vmatmul.f32.gmra.mxu1 %v534_v58  ;;  %307 = vmatmul.f32.gmra.mxu3 %v531_v59 }
 0x114   :  { %v535_v60 = vpop.trf.xlu0 }
 0x115   :  { %v539_v61 = vunpack.i.h.bf16 %v535_v60  ;;  %v536_v62 = vunpack.i.l.bf16 %v535_v60 }
 0x117   :  { %262 = vmatmul.f32.gmra.mxu1 %v539_v61  ;;  %310 = vmatmul.f32.gmra.mxu3 %v536_v62 }
 0x11c   :  { %v540_v63 = vpop.trf.xlu0 }
 0x11d   :  { %v544_v0 = vunpack.i.h.bf16 %v540_v63  ;;  %v541_v1 = vunpack.i.l.bf16 %v540_v63 }
 0x11f   :  { %265 = vmatmul.f32.gmra.mxu1 %v544_v0  ;;  %313 = vmatmul.f32.gmra.mxu3 %v541_v1 }
 0x124   :  { %v545_v5 = vpop.trf.xlu0 }
 0x125   :  { %v549_v7 = vunpack.i.h.bf16 %v545_v5  ;;  %v546_v8 = vunpack.i.l.bf16 %v545_v5 }
 0x127   :  { %268 = vmatmul.f32.gmra.mxu1 %v549_v7  ;;  %316 = vmatmul.f32.gmra.mxu3 %v546_v8 }
 0x12c   :  { %v224_v9 = vpop.f32.mrf.mxu0 }
 0x12d   :  { %321 = vst.msk [vmem:[%s834_s2] sm:$0xff] %vm320_vm0, %v224_v9 }
 0x132   :  { %v272_v10 = vpop.f32.mrf.mxu2 }
 0x133   :  { %337 = vst.msk [vmem:[%s834_s2 + $0x80] sm:$0xff] %vm320_vm0, %v272_v10 }
 0x134   :  { %v227_v11 = vpop.f32.mrf.mxu0 }
 0x135   :  { %322 = vst.msk [vmem:[%s834_s2 + $0x8] sm:$0xff] %vm320_vm0, %v227_v11 }
 0x13a   :  { %v275_v12 = vpop.f32.mrf.mxu2 }
 0x13b   :  { %338 = vst.msk [vmem:[%s834_s2 + $0x88] sm:$0xff] %vm320_vm0, %v275_v12 }
 0x13c   :  { %v230_v13 = vpop.f32.mrf.mxu0 }
 0x13d   :  { %323 = vst.msk [vmem:[%s834_s2 + $0x10] sm:$0xff] %vm320_vm0, %v230_v13 }
 0x142   :  { %v278_v14 = vpop.f32.mrf.mxu2 }
 0x143   :  { %339 = vst.msk [vmem:[%s834_s2 + $0x90] sm:$0xff] %vm320_vm0, %v278_v14 }
 0x144   :  { %v233_v15 = vpop.f32.mrf.mxu0 }
 0x145   :  { %324 = vst.msk [vmem:[%s834_s2 + $0x18] sm:$0xff] %vm320_vm0, %v233_v15 }
 0x14a   :  { %v281_v16 = vpop.f32.mrf.mxu2 }
 0x14b   :  { %340 = vst.msk [vmem:[%s834_s2 + $0x98] sm:$0xff] %vm320_vm0, %v281_v16 }
 0x14c   :  { %v236_v17 = vpop.f32.mrf.mxu0 }
 0x14d   :  { %325 = vst.msk [vmem:[%s834_s2 + $0x20] sm:$0xff] %vm320_vm0, %v236_v17 }
 0x152   :  { %v284_v2 = vpop.f32.mrf.mxu2 }
 0x153   :  { %341 = vst.msk [vmem:[%s834_s2 + $0xa0] sm:$0xff] %vm320_vm0, %v284_v2 }
 0x154   :  { %v239_v18 = vpop.f32.mrf.mxu0 }
 0x155   :  { %326 = vst.msk [vmem:[%s834_s2 + $0x28] sm:$0xff] %vm320_vm0, %v239_v18 }
 0x15a   :  { %v287_v19 = vpop.f32.mrf.mxu2 }
 0x15b   :  { %342 = vst.msk [vmem:[%s834_s2 + $0xa8] sm:$0xff] %vm320_vm0, %v287_v19 }
 0x15c   :  { %v242_v3 = vpop.f32.mrf.mxu0 }
 0x15d   :  { %327 = vst.msk [vmem:[%s834_s2 + $0x30] sm:$0xff] %vm320_vm0, %v242_v3 }
 0x162   :  { %v290_v4 = vpop.f32.mrf.mxu2 }
 0x163   :  { %343 = vst.msk [vmem:[%s834_s2 + $0xb0] sm:$0xff] %vm320_vm0, %v290_v4 }
 0x164   :  { %v245_v20 = vpop.f32.mrf.mxu0 }
 0x165   :  { %328 = vst.msk [vmem:[%s834_s2 + $0x38] sm:$0xff] %vm320_vm0, %v245_v20 }
 0x16a   :  { %v293_v6 = vpop.f32.mrf.mxu2 }
 0x16b   :  { %344 = vst.msk [vmem:[%s834_s2 + $0xb8] sm:$0xff] %vm320_vm0, %v293_v6 }
 0x16c   :  { %v248_v21 = vpop.f32.mrf.mxu1 }
 0x16d   :  { %329 = vst.msk [vmem:[%s834_s2 + $0x40] sm:$0xff] %vm320_vm0, %v248_v21 }
 0x172   :  { %v296_v22 = vpop.f32.mrf.mxu3 }
 0x173   :  { %345 = vst.msk [vmem:[%s834_s2 + $0xc0] sm:$0xff] %vm320_vm0, %v296_v22 }
 0x174   :  { %v251_v23 = vpop.f32.mrf.mxu1 }
 0x175   :  { %330 = vst.msk [vmem:[%s834_s2 + $0x48] sm:$0xff] %vm320_vm0, %v251_v23 }
 0x17a   :  { %v299_v24 = vpop.f32.mrf.mxu3 }
 0x17b   :  { %346 = vst.msk [vmem:[%s834_s2 + $0xc8] sm:$0xff] %vm320_vm0, %v299_v24 }
 0x17c   :  { %v254_v25 = vpop.f32.mrf.mxu1 }
 0x17d   :  { %331 = vst.msk [vmem:[%s834_s2 + $0x50] sm:$0xff] %vm320_vm0, %v254_v25 }
 0x182   :  { %v302_v26 = vpop.f32.mrf.mxu3 }
 0x183   :  { %347 = vst.msk [vmem:[%s834_s2 + $0xd0] sm:$0xff] %vm320_vm0, %v302_v26 }
 0x184   :  { %v257_v27 = vpop.f32.mrf.mxu1 }
 0x185   :  { %332 = vst.msk [vmem:[%s834_s2 + $0x58] sm:$0xff] %vm320_vm0, %v257_v27 }
 0x18a   :  { %v305_v28 = vpop.f32.mrf.mxu3 }
 0x18b   :  { %348 = vst.msk [vmem:[%s834_s2 + $0xd8] sm:$0xff] %vm320_vm0, %v305_v28 }
 0x18c   :  { %v260_v29 = vpop.f32.mrf.mxu1 }
 0x18d   :  { %333 = vst.msk [vmem:[%s834_s2 + $0x60] sm:$0xff] %vm320_vm0, %v260_v29 }
 0x192   :  { %v308_v30 = vpop.f32.mrf.mxu3 }
 0x193   :  { %349 = vst.msk [vmem:[%s834_s2 + $0xe0] sm:$0xff] %vm320_vm0, %v308_v30 }
 0x194   :  { %v263_v31 = vpop.f32.mrf.mxu1 }
 0x195   :  { %334 = vst.msk [vmem:[%s834_s2 + $0x68] sm:$0xff] %vm320_vm0, %v263_v31 }
 0x19a   :  { %v311_v32 = vpop.f32.mrf.mxu3 }
 0x19b   :  { %350 = vst.msk [vmem:[%s834_s2 + $0xe8] sm:$0xff] %vm320_vm0, %v311_v32 }
 0x19c   :  { %v266_v33 = vpop.f32.mrf.mxu1 }
 0x19d   :  { %335 = vst.msk [vmem:[%s834_s2 + $0x70] sm:$0xff] %vm320_vm0, %v266_v33 }
 0x1a2   :  { %v314_v34 = vpop.f32.mrf.mxu3 }
 0x1a3   :  { %351 = vst.msk [vmem:[%s834_s2 + $0xf0] sm:$0xff] %vm320_vm0, %v314_v34 }
 0x1a4   :  { %v269_v35 = vpop.f32.mrf.mxu1 }
 0x1a5   :  { %336 = vst.msk [vmem:[%s834_s2 + $0x78] sm:$0xff] %vm320_vm0, %v269_v35 }
 0x1aa   :  { %v317_v36 = vpop.f32.mrf.mxu3 }
 0x1ab   :  { %352 = vst.msk [vmem:[%s834_s2 + $0xf8] sm:$0xff] %vm320_vm0, %v317_v36 }

// kernel: tpu_custom_call.1
= control target key start
LH: loop header
LB: loop body
LE: loop exit
PB: predicated region body
PF: predicated region fallthrough
CT: control target
= control target key end

     0   :  { %v12_v0 = vlaneseq  ;;  %v550_v6 = vmov 0.0   ;;  %s832_s0 = inlined_call_operand.vmem [shape: s32[1,256], index: 0, kind: input, shape index: {}]   ;;  %s833_s1 = inlined_call_operand.vmem [shape: f32[128,32], index: 1, kind: input, shape index: {}]   ;;  %s834_s2 = inlined_call_operand.vmem [shape: f32[256,32], index: 2, kind: output, shape index: {}]  }
   0x1   :  { %v11_v1 = vld [vmem:[%s832_s0] sm:$0x3]  ;;  %v142_v54 = vld [vmem:[%s833_s1 + $0x78] sm:$0xff]  ;;  %v141_v55 = vld [vmem:[%s833_s1 + $0x70] sm:$0xff] }
   0x2   :  { %v569_v2 = vshrl.u32 %v12_v0, 7  ;;  %v571_v3 = vperm.slane %v11_v1, 0  ;;  %v573_v4 = vperm.slane %v11_v1, 1  ;;  %207 = vmatpush.msra.mxu0 %v142_v54  ;;  %390 = vmatpush.msra.mxu2 %v142_v54  ;;  %v140_v59 = vld [vmem:[%s833_s1 + $0x68] sm:$0xff]  ;;  %v139_v61 = vld [vmem:[%s833_s1 + $0x60] sm:$0xff]  ;;  %v138_v62 = vld [vmem:[%s833_s1 + $0x58] sm:$0xff] }
   0x3   :  { %389 = vmatpush.msra.mxu1 %v142_v54  ;;  %391 = vmatpush.msra.mxu3 %v142_v54  ;;  %v137_v63 = vld [vmem:[%s833_s1 + $0x50] sm:$0xff] }
   0x4   :  { %vm31_vm0 = vcmp.eq.s32.totalorder %v569_v2, %v571_v3  ;;  %vm32_vm1 = vcmp.eq.s32.totalorder %v569_v2, %v573_v4  ;;  %v14_v5 = vadd.s32 8, %v569_v2  ;;  %v15_v12 = vadd.s32 16, %v569_v2  ;;  %208 = vmatpush.msra.mxu0 %v141_v55  ;;  %393 = vmatpush.msra.mxu2 %v141_v55 }
   0x5   :  { %v357_v7 = vsel %vm31_vm0, 1.0, %v550_v6  ;;  %v358_v8 = vsel %vm32_vm1, 1.0, %v550_v6  ;;  %v16_v16 = vadd.s32 24, %v569_v2  ;;  %v17_v20 = vadd.s32 32, %v569_v2  ;;  %392 = vmatpush.msra.mxu1 %v141_v55  ;;  %394 = vmatpush.msra.mxu3 %v141_v55 }
   0x6   :  { %v438_v9 = vpack.i.bf16 %v357_v7, %v358_v8  ;;  %vm33_vm2 = vcmp.eq.s32.totalorder %v14_v5, %v571_v3  ;;  %vm34_vm3 = vcmp.eq.s32.totalorder %v14_v5, %v573_v4  ;;  %vm35_vm4 = vcmp.eq.s32.totalorder %v15_v12, %v571_v3  ;;  %209 = vmatpush.msra.mxu0 %v140_v59  ;;  %v136_v7 = vld [vmem:[%s833_s1 + $0x48] sm:$0xff] }
   0x7   :  { %v359_v10 = vsel %vm33_vm2, 1.0, %v550_v6  ;;  %v360_v11 = vsel %vm34_vm3, 1.0, %v550_v6  ;;  %vm36_vm5 = vcmp.eq.s32.totalorder %v15_v12, %v573_v4  ;;  %v361_v14 = vsel %vm35_vm4, 1.0, %v550_v6  ;;  %396 = vmatpush.msra.mxu2 %v140_v59  ;;  %395 = vmatpush.msra.mxu1 %v140_v59 }
   0x8   :  { %439 = vxpose.xlu0.b32.start [1/16] %v438_v9, 128  ;;  %v440_v13 = vpack.i.bf16 %v359_v10, %v360_v11  ;;  %v362_v15 = vsel %vm36_vm5, 1.0, %v550_v6  ;;  %vm37_vm6 = vcmp.eq.s32.totalorder %v16_v16, %v571_v3  ;;  %vm38_vm7 = vcmp.eq.s32.totalorder %v16_v16, %v573_v4  ;;  %397 = vmatpush.msra.mxu3 %v140_v59  ;;  %v135_v9 = vld [vmem:[%s833_s1 + $0x40] sm:$0xff]  ;;  %v134_v10 = vld [vmem:[%s833_s1 + $0x38] sm:$0xff]  ;;  %v133_v11 = vld [vmem:[%s833_s1 + $0x30] sm:$0xff] }
   0x9   :  { %v442_v17 = vpack.i.bf16 %v361_v14, %v362_v15  ;;  %v363_v18 = vsel %vm37_vm6, 1.0, %v550_v6  ;;  %v364_v19 = vsel %vm38_vm7, 1.0, %v550_v6  ;;  %vm39_vm8 = vcmp.eq.s32.totalorder %v17_v20, %v571_v3  ;;  %210 = vmatpush.msra.mxu0 %v139_v61  ;;  %399 = vmatpush.msra.mxu2 %v139_v61  ;;  %v132_v15 = vld [vmem:[%s833_s1 + $0x28] sm:$0xff] }
   0xa   :  { %v444_v21 = vpack.i.bf16 %v363_v18, %v364_v19  ;;  %vm40_vm9 = vcmp.eq.s32.totalorder %v17_v20, %v573_v4  ;;  %v365_v22 = vsel %vm39_vm8, 1.0, %v550_v6  ;;  %v18_v24 = vadd.s32 40, %v569_v2  ;;  %398 = vmatpush.msra.mxu1 %v139_v61  ;;  %400 = vmatpush.msra.mxu3 %v139_v61  ;;  %v129_v18 = vld [vmem:[%s833_s1 + $0x10] sm:$0xff] }
   0xb   :  { %v366_v23 = vsel %vm40_vm9, 1.0, %v550_v6  ;;  %v19_v28 = vadd.s32 48, %v569_v2  ;;  %v20_v32 = vadd.s32 56, %v569_v2  ;;  %v21_v36 = vadd.s32 64, %v569_v2  ;;  %211 = vmatpush.msra.mxu0 %v138_v62  ;;  %402 = vmatpush.msra.mxu2 %v138_v62 }
   0xc   :  { %v446_v25 = vpack.i.bf16 %v365_v22, %v366_v23  ;;  %vm41_vm10 = vcmp.eq.s32.totalorder %v18_v24, %v571_v3  ;;  %vm42_vm11 = vcmp.eq.s32.totalorder %v18_v24, %v573_v4  ;;  %v22_v40 = vadd.s32 72, %v569_v2  ;;  %401 = vmatpush.msra.mxu1 %v138_v62  ;;  %403 = vmatpush.msra.mxu3 %v138_v62 }
   0xd   :  { %v367_v26 = vsel %vm41_vm10, 1.0, %v550_v6  ;;  %v368_v27 = vsel %vm42_vm11, 1.0, %v550_v6  ;;  %vm43_vm12 = vcmp.eq.s32.totalorder %v19_v28, %v571_v3  ;;  %vm44_vm13 = vcmp.eq.s32.totalorder %v19_v28, %v573_v4  ;;  %212 = vmatpush.msra.mxu0 %v137_v63  ;;  %405 = vmatpush.msra.mxu2 %v137_v63 }
   0xe   :  { %v448_v29 = vpack.i.bf16 %v367_v26, %v368_v27  ;;  %v369_v30 = vsel %vm43_vm12, 1.0, %v550_v6  ;;  %v370_v31 = vsel %vm44_vm13, 1.0, %v550_v6  ;;  %vm45_vm14 = vcmp.eq.s32.totalorder %v20_v32, %v571_v3  ;;  %404 = vmatpush.msra.mxu1 %v137_v63  ;;  %406 = vmatpush.msra.mxu3 %v137_v63 }
   0xf   :  { %v450_v33 = vpack.i.bf16 %v369_v30, %v370_v31  ;;  %vm46_vm15 = vcmp.eq.s32.totalorder %v20_v32, %v573_v4  ;;  %v371_v34 = vsel %vm45_vm14, 1.0, %v550_v6  ;;  %vm47_vm0 = vcmp.eq.s32.totalorder %v21_v36, %v571_v3  ;;  %213 = vmatpush.msra.mxu0 %v136_v7  ;;  %408 = vmatpush.msra.mxu2 %v136_v7 }
  0x10   :  { %441 = vxpose.xlu0.b32.cont [2/16] %v440_v13, 128  ;;  %v372_v35 = vsel %vm46_vm15, 1.0, %v550_v6  ;;  %vm48_vm1 = vcmp.eq.s32.totalorder %v21_v36, %v573_v4  ;;  %v373_v38 = vsel %vm47_vm0, 1.0, %v550_v6  ;;  %vm49_vm2 = vcmp.eq.s32.totalorder %v22_v40, %v571_v3  ;;  %407 = vmatpush.msra.mxu1 %v136_v7 }
  0x11   :  { %v452_v37 = vpack.i.bf16 %v371_v34, %v372_v35  ;;  %v374_v39 = vsel %vm48_vm1, 1.0, %v550_v6  ;;  %vm50_vm3 = vcmp.eq.s32.totalorder %v22_v40, %v573_v4  ;;  %v375_v42 = vsel %vm49_vm2, 1.0, %v550_v6  ;;  %214 = vmatpush.msra.mxu0 %v135_v9  ;;  %411 = vmatpush.msra.mxu2 %v135_v9 }
  0x12   :  { %v454_v41 = vpack.i.bf16 %v373_v38, %v374_v39  ;;  %v376_v43 = vsel %vm50_vm3, 1.0, %v550_v6  ;;  %v23_v44 = vadd.s32 80, %v569_v2  ;;  %v24_v48 = vadd.s32 88, %v569_v2  ;;  %409 = vmatpush.msra.mxu3 %v136_v7  ;;  %410 = vmatpush.msra.mxu1 %v135_v9 }
  0x13   :  { %v456_v45 = vpack.i.bf16 %v375_v42, %v376_v43  ;;  %v25_v52 = vadd.s32 96, %v569_v2  ;;  %v26_v58 = vadd.s32 104, %v569_v2  ;;  %v27_v5 = vadd.s32 112, %v569_v2  ;;  %215 = vmatpush.msra.mxu0 %v134_v10  ;;  %414 = vmatpush.msra.mxu2 %v134_v10 }
  0x14   :  { %vm51_vm4 = vcmp.eq.s32.totalorder %v23_v44, %v571_v3  ;;  %vm52_vm5 = vcmp.eq.s32.totalorder %v23_v44, %v573_v4  ;;  %vm53_vm6 = vcmp.eq.s32.totalorder %v24_v48, %v571_v3  ;;  %vm54_vm7 = vcmp.eq.s32.totalorder %v24_v48, %v573_v4  ;;  %412 = vmatpush.msra.mxu3 %v135_v9 }
  0x15   :  { %v377_v46 = vsel %vm51_vm4, 1.0, %v550_v6  ;;  %v378_v47 = vsel %vm52_vm5, 1.0, %v550_v6  ;;  %v379_v50 = vsel %vm53_vm6, 1.0, %v550_v6  ;;  %v380_v51 = vsel %vm54_vm7, 1.0, %v550_v6  ;;  %216 = vmatpush.msra.mxu0 %v133_v11  ;;  %417 = vmatpush.msra.mxu2 %v133_v11 }
  0x16   :  { %v458_v49 = vpack.i.bf16 %v377_v46, %v378_v47  ;;  %v460_v53 = vpack.i.bf16 %v379_v50, %v380_v51  ;;  %vm55_vm8 = vcmp.eq.s32.totalorder %v25_v52, %v571_v3  ;;  %vm56_vm9 = vcmp.eq.s32.totalorder %v25_v52, %v573_v4  ;;  %413 = vmatpush.msra.mxu1 %v134_v10 }
  0x17   :  { %v381_v56 = vsel %vm55_vm8, 1.0, %v550_v6  ;;  %v382_v57 = vsel %vm56_vm9, 1.0, %v550_v6  ;;  %vm57_vm10 = vcmp.eq.s32.totalorder %v26_v58, %v571_v3  ;;  %vm58_vm11 = vcmp.eq.s32.totalorder %v26_v58, %v573_v4  ;;  %415 = vmatpush.msra.mxu3 %v134_v10  ;;  %217 = vmatpush.msra.mxu0 %v132_v15 }
  0x18   :  { %443 = vxpose.xlu0.b32.cont [3/16] %v442_v17, 128  ;;  %v462_v60 = vpack.i.bf16 %v381_v56, %v382_v57  ;;  %v383_v0 = vsel %vm57_vm10, 1.0, %v550_v6  ;;  %v384_v1 = vsel %vm58_vm11, 1.0, %v550_v6  ;;  %vm59_vm12 = vcmp.eq.s32.totalorder %v27_v5, %v571_v3  ;;  %v131_v17 = vld [vmem:[%s833_s1 + $0x20] sm:$0xff]  ;;  %420 = vmatpush.msra.mxu2 %v132_v15 }
  0x19   :  { %v464_v8 = vpack.i.bf16 %v383_v0, %v384_v1  ;;  %vm60_vm13 = vcmp.eq.s32.totalorder %v27_v5, %v573_v4  ;;  %v385_v12 = vsel %vm59_vm12, 1.0, %v550_v6  ;;  %v28_v14 = vadd.s32 120, %v569_v2  ;;  %v130_v2 = vld [vmem:[%s833_s1 + $0x18] sm:$0xff]  ;;  %416 = vmatpush.msra.mxu1 %v133_v11  ;;  %418 = vmatpush.msra.mxu3 %v133_v11 }
  0x1a   :  { %v386_v13 = vsel %vm60_vm13, 1.0, %v550_v6  ;;  %218 = vmatpush.msra.mxu0 %v131_v17  ;;  %423 = vmatpush.msra.mxu2 %v131_v17  ;;  %vm320_vm0 = vcmask 261120  }
  0x1b   :  { %v466_v16 = vpack.i.bf16 %v385_v12, %v386_v13  ;;  %vm61_vm14 = vcmp.eq.s32.totalorder %v28_v14, %v571_v3  ;;  %vm62_vm15 = vcmp.eq.s32.totalorder %v28_v14, %v573_v4  ;;  %419 = vmatpush.msra.mxu1 %v132_v15  ;;  %v128_v4 = vld [vmem:[%s833_s1 + $0x8] sm:$0xff]  ;;  %421 = vmatpush.msra.mxu3 %v132_v15 }
  0x1c   :  { %v387_v19 = vsel %vm61_vm14, 1.0, %v550_v6  ;;  %v388_v3 = vsel %vm62_vm15, 1.0, %v550_v6  ;;  %219 = vmatpush.msra.mxu0 %v130_v2  ;;  %426 = vmatpush.msra.mxu2 %v130_v2  ;;  %v127_v6 = vld [vmem:[%s833_s1] sm:$0xff] }
  0x1d   :  { %422 = vmatpush.msra.mxu1 %v131_v17  ;;  %v468_v20 = vpack.i.bf16 %v387_v19, %v388_v3  ;;  %424 = vmatpush.msra.mxu3 %v131_v17 }
  0x1e   :  { %220 = vmatpush.msra.mxu0 %v129_v18  ;;  %429 = vmatpush.msra.mxu2 %v129_v18 }
  0x1f   :  { %425 = vmatpush.msra.mxu1 %v130_v2  ;;  %427 = vmatpush.msra.mxu3 %v130_v2 }
  0x20   :  { %445 = vxpose.xlu0.b32.cont [4/16] %v444_v21, 128  ;;  %221 = vmatpush.msra.mxu0 %v128_v4 }
  0x21   :  { %432 = vmatpush.msra.mxu2 %v128_v4  ;;  %428 = vmatpush.msra.mxu1 %v129_v18 }
  0x22   :  { %430 = vmatpush.msra.mxu3 %v129_v18  ;;  %222 = vmatpush.msra.mxu0 %v127_v6 }
  0x23   :  { %431 = vmatpush.msra.mxu1 %v128_v4  ;;  %435 = vmatpush.msra.mxu2 %v127_v6 }
  0x24   :  { %433 = vmatpush.msra.mxu3 %v128_v4 }
  0x25   :  { %434 = vmatpush.msra.mxu1 %v127_v6 }
  0x26   :  { %436 = vmatpush.msra.mxu3 %v127_v6 }
  0x28   :  { %447 = vxpose.xlu0.b32.cont [5/16] %v446_v25, 128 }
  0x30   :  { %449 = vxpose.xlu0.b32.cont [6/16] %v448_v29, 128 }
  0x38   :  { %451 = vxpose.xlu0.b32.cont [7/16] %v450_v33, 128 }
  0x40   :  { %453 = vxpose.xlu0.b32.cont [8/16] %v452_v37, 128 }
  0x48   :  { %455 = vxpose.xlu0.b32.cont [9/16] %v454_v41, 128 }
  0x50   :  { %457 = vxpose.xlu0.b32.cont [10/16] %v456_v45, 128 }
  0x58   :  { %459 = vxpose.xlu0.b32.cont [11/16] %v458_v49, 128 }
  0x60   :  { %461 = vxpose.xlu0.b32.cont [12/16] %v460_v53, 128 }
  0x68   :  { %463 = vxpose.xlu0.b32.cont [13/16] %v462_v60, 128 }
  0x70   :  { %465 = vxpose.xlu0.b32.cont [14/16] %v464_v8, 128 }
  0x78   :  { %467 = vxpose.xlu0.b32.cont [15/16] %v466_v16, 128 }
  0x80   :  { %469 = vxpose.xlu0.b32.end [16/16] %v468_v20, 128 }
  0xac   :  { %v470_v21 = vpop.trf.xlu0 }
  0xad   :  { %v474_v22 = vunpack.i.h.bf16 %v470_v21  ;;  %v471_v23 = vunpack.i.l.bf16 %v470_v21 }
  0xaf   :  { %223 = vmatmul.f32.vlgmr.msra.gmra.mxu0 %v474_v22  ;;  %271 = vmatmul.f32.vlgmr.msra.gmra.mxu2 %v471_v23 }
  0xb4   :  { %v475_v24 = vpop.trf.xlu0 }
  0xb5   :  { %v479_v25 = vunpack.i.h.bf16 %v475_v24  ;;  %v476_v26 = vunpack.i.l.bf16 %v475_v24 }
  0xb7   :  { %226 = vmatmul.f32.gmra.mxu0 %v479_v25  ;;  %274 = vmatmul.f32.gmra.mxu2 %v476_v26 }
  0xbc   :  { %v480_v27 = vpop.trf.xlu0 }
  0xbd   :  { %v484_v28 = vunpack.i.h.bf16 %v480_v27  ;;  %v481_v29 = vunpack.i.l.bf16 %v480_v27 }
  0xbf   :  { %229 = vmatmul.f32.gmra.mxu0 %v484_v28  ;;  %277 = vmatmul.f32.gmra.mxu2 %v481_v29 }
  0xc4   :  { %v485_v30 = vpop.trf.xlu0 }
  0xc5   :  { %v489_v31 = vunpack.i.h.bf16 %v485_v30  ;;  %v486_v32 = vunpack.i.l.bf16 %v485_v30 }
  0xc7   :  { %232 = vmatmul.f32.gmra.mxu0 %v489_v31  ;;  %280 = vmatmul.f32.gmra.mxu2 %v486_v32 }
  0xcc   :  { %v490_v33 = vpop.trf.xlu0 }
  0xcd   :  { %v494_v34 = vunpack.i.h.bf16 %v490_v33  ;;  %v491_v35 = vunpack.i.l.bf16 %v490_v33 }
  0xcf   :  { %235 = vmatmul.f32.gmra.mxu0 %v494_v34  ;;  %283 = vmatmul.f32.gmra.mxu2 %v491_v35 }
  0xd4   :  { %v495_v36 = vpop.trf.xlu0 }
  0xd5   :  { %v499_v37 = vunpack.i.h.bf16 %v495_v36  ;;  %v496_v38 = vunpack.i.l.bf16 %v495_v36 }
  0xd7   :  { %238 = vmatmul.f32.gmra.mxu0 %v499_v37  ;;  %286 = vmatmul.f32.gmra.mxu2 %v496_v38 }
  0xdc   :  { %v500_v39 = vpop.trf.xlu0 }
  0xdd   :  { %v504_v40 = vunpack.i.h.bf16 %v500_v39  ;;  %v501_v41 = vunpack.i.l.bf16 %v500_v39 }
  0xdf   :  { %241 = vmatmul.f32.gmra.mxu0 %v504_v40  ;;  %289 = vmatmul.f32.gmra.mxu2 %v501_v41 }
  0xe4   :  { %v505_v42 = vpop.trf.xlu0 }
  0xe5   :  { %v509_v43 = vunpack.i.h.bf16 %v505_v42  ;;  %v506_v44 = vunpack.i.l.bf16 %v505_v42 }
  0xe7   :  { %244 = vmatmul.f32.gmra.mxu0 %v509_v43  ;;  %292 = vmatmul.f32.gmra.mxu2 %v506_v44 }
  0xec   :  { %v510_v45 = vpop.trf.xlu0 }
  0xed   :  { %v514_v46 = vunpack.i.h.bf16 %v510_v45  ;;  %v511_v47 = vunpack.i.l.bf16 %v510_v45 }
  0xef   :  { %247 = vmatmul.f32.vlgmr.msra.gmra.mxu1 %v514_v46  ;;  %295 = vmatmul.f32.vlgmr.msra.gmra.mxu3 %v511_v47 }
  0xf4   :  { %v515_v48 = vpop.trf.xlu0 }
  0xf5   :  { %v519_v49 = vunpack.i.h.bf16 %v515_v48  ;;  %v516_v50 = vunpack.i.l.bf16 %v515_v48 }
  0xf7   :  { %250 = vmatmul.f32.gmra.mxu1 %v519_v49  ;;  %298 = vmatmul.f32.gmra.mxu3 %v516_v50 }
  0xfc   :  { %v520_v51 = vpop.trf.xlu0 }
  0xfd   :  { %v524_v52 = vunpack.i.h.bf16 %v520_v51  ;;  %v521_v53 = vunpack.i.l.bf16 %v520_v51 }
  0xff   :  { %253 = vmatmul.f32.gmra.mxu1 %v524_v52  ;;  %301 = vmatmul.f32.gmra.mxu3 %v521_v53 }
 0x104   :  { %v525_v54 = vpop.trf.xlu0 }
 0x105   :  { %v529_v55 = vunpack.i.h.bf16 %v525_v54  ;;  %v526_v56 = vunpack.i.l.bf16 %v525_v54 }
 0x107   :  { %256 = vmatmul.f32.gmra.mxu1 %v529_v55  ;;  %304 = vmatmul.f32.gmra.mxu3 %v526_v56 }
 0x10c   :  { %v530_v57 = vpop.trf.xlu0 }
 0x10d   :  { %v534_v58 = vunpack.i.h.bf16 %v530_v57  ;;  %v531_v59 = vunpack.i.l.bf16 %v530_v57 }
 0x10f   :  { %259 = vmatmul.f32.gmra.mxu1 %v534_v58  ;;  %307 = vmatmul.f32.gmra.mxu3 %v531_v59 }
 0x114   :  { %v535_v60 = vpop.trf.xlu0 }
 0x115   :  { %v539_v61 = vunpack.i.h.bf16 %v535_v60  ;;  %v536_v62 = vunpack.i.l.bf16 %v535_v60 }
 0x117   :  { %262 = vmatmul.f32.gmra.mxu1 %v539_v61  ;;  %310 = vmatmul.f32.gmra.mxu3 %v536_v62 }
 0x11c   :  { %v540_v63 = vpop.trf.xlu0 }
 0x11d   :  { %v544_v0 = vunpack.i.h.bf16 %v540_v63  ;;  %v541_v1 = vunpack.i.l.bf16 %v540_v63 }
 0x11f   :  { %265 = vmatmul.f32.gmra.mxu1 %v544_v0  ;;  %313 = vmatmul.f32.gmra.mxu3 %v541_v1 }
 0x124   :  { %v545_v5 = vpop.trf.xlu0 }
 0x125   :  { %v549_v7 = vunpack.i.h.bf16 %v545_v5  ;;  %v546_v8 = vunpack.i.l.bf16 %v545_v5 }
 0x127   :  { %268 = vmatmul.f32.gmra.mxu1 %v549_v7  ;;  %316 = vmatmul.f32.gmra.mxu3 %v546_v8 }
 0x12c   :  { %v224_v9 = vpop.f32.mrf.mxu0 }
 0x12d   :  { %321 = vst.msk [vmem:[%s834_s2] sm:$0xff] %vm320_vm0, %v224_v9 }
 0x132   :  { %v272_v10 = vpop.f32.mrf.mxu2 }
 0x133   :  { %337 = vst.msk [vmem:[%s834_s2 + $0x80] sm:$0xff] %vm320_vm0, %v272_v10 }
 0x134   :  { %v227_v11 = vpop.f32.mrf.mxu0 }
 0x135   :  { %322 = vst.msk [vmem:[%s834_s2 + $0x8] sm:$0xff] %vm320_vm0, %v227_v11 }
 0x13a   :  { %v275_v12 = vpop.f32.mrf.mxu2 }
 0x13b   :  { %338 = vst.msk [vmem:[%s834_s2 + $0x88] sm:$0xff] %vm320_vm0, %v275_v12 }
 0x13c   :  { %v230_v13 = vpop.f32.mrf.mxu0 }
 0x13d   :  { %323 = vst.msk [vmem:[%s834_s2 + $0x10] sm:$0xff] %vm320_vm0, %v230_v13 }
 0x142   :  { %v278_v14 = vpop.f32.mrf.mxu2 }
 0x143   :  { %339 = vst.msk [vmem:[%s834_s2 + $0x90] sm:$0xff] %vm320_vm0, %v278_v14 }
 0x144   :  { %v233_v15 = vpop.f32.mrf.mxu0 }
 0x145   :  { %324 = vst.msk [vmem:[%s834_s2 + $0x18] sm:$0xff] %vm320_vm0, %v233_v15 }
 0x14a   :  { %v281_v16 = vpop.f32.mrf.mxu2 }
 0x14b   :  { %340 = vst.msk [vmem:[%s834_s2 + $0x98] sm:$0xff] %vm320_vm0, %v281_v16 }
 0x14c   :  { %v236_v17 = vpop.f32.mrf.mxu0 }
 0x14d   :  { %325 = vst.msk [vmem:[%s834_s2 + $0x20] sm:$0xff] %vm320_vm0, %v236_v17 }
 0x152   :  { %v284_v2 = vpop.f32.mrf.mxu2 }
 0x153   :  { %341 = vst.msk [vmem:[%s834_s2 + $0xa0] sm:$0xff] %vm320_vm0, %v284_v2 }
 0x154   :  { %v239_v18 = vpop.f32.mrf.mxu0 }
 0x155   :  { %326 = vst.msk [vmem:[%s834_s2 + $0x28] sm:$0xff] %vm320_vm0, %v239_v18 }
 0x15a   :  { %v287_v19 = vpop.f32.mrf.mxu2 }
 0x15b   :  { %342 = vst.msk [vmem:[%s834_s2 + $0xa8] sm:$0xff] %vm320_vm0, %v287_v19 }
 0x15c   :  { %v242_v3 = vpop.f32.mrf.mxu0 }
 0x15d   :  { %327 = vst.msk [vmem:[%s834_s2 + $0x30] sm:$0xff] %vm320_vm0, %v242_v3 }
 0x162   :  { %v290_v4 = vpop.f32.mrf.mxu2 }
 0x163   :  { %343 = vst.msk [vmem:[%s834_s2 + $0xb0] sm:$0xff] %vm320_vm0, %v290_v4 }
 0x164   :  { %v245_v20 = vpop.f32.mrf.mxu0 }
 0x165   :  { %328 = vst.msk [vmem:[%s834_s2 + $0x38] sm:$0xff] %vm320_vm0, %v245_v20 }
 0x16a   :  { %v293_v6 = vpop.f32.mrf.mxu2 }
 0x16b   :  { %344 = vst.msk [vmem:[%s834_s2 + $0xb8] sm:$0xff] %vm320_vm0, %v293_v6 }
 0x16c   :  { %v248_v21 = vpop.f32.mrf.mxu1 }
 0x16d   :  { %329 = vst.msk [vmem:[%s834_s2 + $0x40] sm:$0xff] %vm320_vm0, %v248_v21 }
 0x172   :  { %v296_v22 = vpop.f32.mrf.mxu3 }
 0x173   :  { %345 = vst.msk [vmem:[%s834_s2 + $0xc0] sm:$0xff] %vm320_vm0, %v296_v22 }
 0x174   :  { %v251_v23 = vpop.f32.mrf.mxu1 }
 0x175   :  { %330 = vst.msk [vmem:[%s834_s2 + $0x48] sm:$0xff] %vm320_vm0, %v251_v23 }
 0x17a   :  { %v299_v24 = vpop.f32.mrf.mxu3 }
 0x17b   :  { %346 = vst.msk [vmem:[%s834_s2 + $0xc8] sm:$0xff] %vm320_vm0, %v299_v24 }
 0x17c   :  { %v254_v25 = vpop.f32.mrf.mxu1 }
 0x17d   :  { %331 = vst.msk [vmem:[%s834_s2 + $0x50] sm:$0xff] %vm320_vm0, %v254_v25 }
 0x182   :  { %v302_v26 = vpop.f32.mrf.mxu3 }
 0x183   :  { %347 = vst.msk [vmem:[%s834_s2 + $0xd0] sm:$0xff] %vm320_vm0, %v302_v26 }
 0x184   :  { %v257_v27 = vpop.f32.mrf.mxu1 }
 0x185   :  { %332 = vst.msk [vmem:[%s834_s2 + $0x58] sm:$0xff] %vm320_vm0, %v257_v27 }
 0x18a   :  { %v305_v28 = vpop.f32.mrf.mxu3 }
 0x18b   :  { %348 = vst.msk [vmem:[%s834_s2 + $0xd8] sm:$0xff] %vm320_vm0, %v305_v28 }
 0x18c   :  { %v260_v29 = vpop.f32.mrf.mxu1 }
 0x18d   :  { %333 = vst.msk [vmem:[%s834_s2 + $0x60] sm:$0xff] %vm320_vm0, %v260_v29 }
 0x192   :  { %v308_v30 = vpop.f32.mrf.mxu3 }
 0x193   :  { %349 = vst.msk [vmem:[%s834_s2 + $0xe0] sm:$0xff] %vm320_vm0, %v308_v30 }
 0x194   :  { %v263_v31 = vpop.f32.mrf.mxu1 }
 0x195   :  { %334 = vst.msk [vmem:[%s834_s2 + $0x68] sm:$0xff] %vm320_vm0, %v263_v31 }
 0x19a   :  { %v311_v32 = vpop.f32.mrf.mxu3 }
 0x19b   :  { %350 = vst.msk [vmem:[%s834_s2 + $0xe8] sm:$0xff] %vm320_vm0, %v311_v32 }
 0x19c   :  { %v266_v33 = vpop.f32.mrf.mxu1 }
 0x19d   :  { %335 = vst.msk [vmem:[%s834_s2 + $0x70] sm:$0xff] %vm320_vm0, %v266_v33 }
 0x1a2   :  { %v314_v34 = vpop.f32.mrf.mxu3 }
 0x1a3   :  { %351 = vst.msk [vmem:[%s834_s2 + $0xf0] sm:$0xff] %vm320_vm0, %v314_v34 }
 0x1a4   :  { %v269_v35 = vpop.f32.mrf.mxu1 }
 0x1a5   :  { %336 = vst.msk [vmem:[%s834_s2 + $0x78] sm:$0xff] %vm320_vm0, %v269_v35 }
 0x1aa   :  { %v317_v36 = vpop.f32.mrf.mxu3 }
 0x1ab   :  { %352 = vst.msk [vmem:[%s834_s2 + $0xf8] sm:$0xff] %vm320_vm0, %v317_v36 }

</bundles_post_ra>
